<compile_context>
chip_gen: v5e
topology: v5e:2x2
jax: 0.10.0
libtpu: 0.0.40
codegen_flags: <defaults>
</compile_context>

<pallas_src>
import jax
import jax.numpy as jnp
from jax.experimental import pallas as pl
from jax.experimental.pallas import tpu as pltpu


def _critic_kernel(inp_ref,
                   w1_ref, b1_ref,
                   w2_ref, b2_ref,
                   w3_ref, b3_ref,
                   wq_ref, bq_ref,
                   q_ref):
    # fc1 on cat([x, actions/max_action]); the 1/max_action scale is already
    # folded into the action rows of w1, so this is a single MXU matmul.
    h = (jnp.dot(inp_ref[...], w1_ref[...], preferred_element_type=jnp.float32)
         + b1_ref[...])
    h = jnp.maximum(h, 0.0)

    # fc2
    h = jnp.dot(h, w2_ref[...], preferred_element_type=jnp.float32) + b2_ref[...]
    h = jnp.maximum(h, 0.0)

    # fc3
    h = jnp.dot(h, w3_ref[...], preferred_element_type=jnp.float32) + b3_ref[...]
    h = jnp.maximum(h, 0.0)

    # q_out (no activation): N=1 output -> VPU mul + lane reduction instead of
    # pushing a 1-column matmul through the MXU.  wq_ref is [1, hidden].
    q_ref[...] = (jnp.sum(h * wq_ref[...], axis=-1, keepdims=True)
                  + bq_ref[...])


def critic_forward(x, actions, params):
    """x: [B, obs+goal] f32, actions: [B, action] f32 -> q: [B, 1] f32."""
    w1, b1, w2, b2, w3, b3, wq_row, bq = params

    # Concat is cheap (feature dim ~17); 1/max_action is already in w1.
    inp = jnp.concatenate([x, actions], axis=1).astype(jnp.float32)
    B, D = inp.shape
    H = w1.shape[1]

    # Batch tile: stream the batch through VMEM in TB-row tiles.  If B fits in
    # one tile, the block equals the full array (always a legal block shape);
    # otherwise TB=256 (multiple of 8 -> legal, fills MXU rows on v6e/v7x).
    TB = 256 if B > 256 else B
    grid = (pl.cdiv(B, TB),)

    def _stream(i):      # batch-tiled arrays
        return (i, 0)

    def _resident(i):    # weights/biases: same block every iteration -> loaded once
        return (0, 0)

    in_specs = [
        pl.BlockSpec((TB, D), _stream),
        pl.BlockSpec(w1.shape, _resident), pl.BlockSpec(b1.shape, _resident),
        pl.BlockSpec(w2.shape, _resident), pl.BlockSpec(b2.shape, _resident),
        pl.BlockSpec(w3.shape, _resident), pl.BlockSpec(b3.shape, _resident),
        pl.BlockSpec(wq_row.shape, _resident), pl.BlockSpec(bq.shape, _resident),
    ]
    out_specs = pl.BlockSpec((TB, 1), _stream)

    return pl.pallas_call(
        _critic_kernel,
        out_shape=jax.ShapeDtypeStruct((B, 1), jnp.float32),
        grid=grid,
        in_specs=in_specs,
        out_specs=out_specs,
        compiler_params=pltpu.CompilerParams(
            dimension_semantics=("parallel",),
        ),
    )(inp, w1, b1, w2, b2, w3, b3, wq_row, bq)


def init_params(key, obs, goal, action, max_action, hidden=256):
    """PyTorch nn.Linear-style init (U[-1/sqrt(fan_in), +]), prepped for the kernel.

    Prep = fold 1/max_action into W1's action rows (exactly equivalent to
    cat([x, actions/max_action]) @ W1), transpose q_out's weight to a [1, H]
    row, and store weight matrices in bf16 (biases stay f32).
    """
    in_dim = obs + goal + action
    dims = [(in_dim, hidden), (hidden, hidden), (hidden, hidden), (hidden, 1)]
    ws, bs = [], []
    for fi, fo in dims:
        key, kw, kb = jax.random.split(key, 3)
        bound = 1.0 / (float(fi) ** 0.5)
        ws.append(jax.random.uniform(kw, (fi, fo), jnp.float32, -bound, bound))
        bs.append(jax.random.uniform(kb, (1, fo), jnp.float32, -bound, bound))
    w1, w2, w3, wq = ws
    b1, b2, b3, bq = bs

    # Fold the actions / max_action scaling into the action rows of W1.
    scale = jnp.concatenate(
        [jnp.ones((obs + goal, 1), jnp.float32),
         jnp.full((action, 1), 1.0 / max_action, jnp.float32)], axis=0)
    w1 = w1 * scale

    wq_row = wq.T  # [1, hidden]

    bf16 = lambda a: a.astype(jnp.bfloat16)
    return (bf16(w1), b1, bf16(w2), b2, bf16(w3), b3, bf16(wq_row), bq)


def _reference(x, actions, params):
    """Pure-JAX reference on the same (prepped) params the kernel consumes."""
    w1, b1, w2, b2, w3, b3, wq_row, bq = params
    f32 = lambda a: a.astype(jnp.float32)
    inp = jnp.concatenate([x, actions], axis=1)
    h = jax.nn.relu(inp @ f32(w1) + b1)
    h = jax.nn.relu(h @ f32(w2) + b2)
    h = jax.nn.relu(h @ f32(w3) + b3)
    return h @ f32(wq_row).T + bq


if __name__ == "__main__":
    # small env_params: obs=10, goal=3, action=4, action_max=1.0
    OBS, GOAL, ACT = 10, 3, 4
    MAX_ACTION = 1.0
    B = 8

    key = jax.random.PRNGKey(0)
    kx, ka, kp = jax.random.split(key, 3)
    x = jax.random.normal(kx, (B, OBS + GOAL), jnp.float32)
    actions = jax.random.normal(ka, (B, ACT), jnp.float32)
    params = init_params(kp, OBS, GOAL, ACT, MAX_ACTION)

    q = critic_forward(x, actions, params)
    q = jax.block_until_ready(q)

    q_ref = _reference(x, actions, params)
    assert q.shape == (B, 1)
    assert jnp.allclose(q, q_ref, atol=1e-3, rtol=1e-3), (
        f"max abs err {jnp.max(jnp.abs(q - q_ref))}")
    print("KERNEL_OK")
</pallas_src>

<mosaic_0001>
module attributes {stable_mosaic.version = 11 : i64} {
  func.func @_critic_kernel(%arg0: i32, %arg1: memref<8x17xf32, #tpu.memory_space<vmem>>, %arg2: memref<17x256xbf16, #tpu.memory_space<vmem>>, %arg3: memref<1x256xf32, #tpu.memory_space<vmem>>, %arg4: memref<256x256xbf16, #tpu.memory_space<vmem>>, %arg5: memref<1x256xf32, #tpu.memory_space<vmem>>, %arg6: memref<256x256xbf16, #tpu.memory_space<vmem>>, %arg7: memref<1x256xf32, #tpu.memory_space<vmem>>, %arg8: memref<1x256xbf16, #tpu.memory_space<vmem>>, %arg9: memref<1x1xf32, #tpu.memory_space<vmem>>, %arg10: memref<8x1xf32, #tpu.memory_space<vmem>>) attributes {dimension_semantics = [#tpu.dimension_semantics<parallel>], iteration_bounds = array<i64: 1>, scalar_prefetch = 0 : i64, scratch_operands = 0 : i64, tpu.core_type = #tpu.core_type<tc>, window_params = [{transform_indices = @transform_0, window_bounds = array<i64: 8, 17>}, {pipeline_mode = #tpu.pipeline_mode<synchronous>, transform_indices = @transform_1, window_bounds = array<i64: 17, 256>}, {pipeline_mode = #tpu.pipeline_mode<synchronous>, transform_indices = @transform_2, window_bounds = array<i64: 1, 256>}, {pipeline_mode = #tpu.pipeline_mode<synchronous>, transform_indices = @transform_3, window_bounds = array<i64: 256, 256>}, {pipeline_mode = #tpu.pipeline_mode<synchronous>, transform_indices = @transform_4, window_bounds = array<i64: 1, 256>}, {pipeline_mode = #tpu.pipeline_mode<synchronous>, transform_indices = @transform_5, window_bounds = array<i64: 256, 256>}, {pipeline_mode = #tpu.pipeline_mode<synchronous>, transform_indices = @transform_6, window_bounds = array<i64: 1, 256>}, {pipeline_mode = #tpu.pipeline_mode<synchronous>, transform_indices = @transform_7, window_bounds = array<i64: 1, 256>}, {pipeline_mode = #tpu.pipeline_mode<synchronous>, transform_indices = @transform_8, window_bounds = array<i64: 1, 1>}, {transform_indices = @transform_9, window_bounds = array<i64: 8, 1>}]} {
    %c0 = arith.constant 0 : index
    %c0_0 = arith.constant 0 : index
    %0 = vector.load %arg1[%c0, %c0_0] : memref<8x17xf32, #tpu.memory_space<vmem>>, vector<8x17xf32>
    %c0_1 = arith.constant 0 : index
    %c0_2 = arith.constant 0 : index
    %1 = vector.load %arg2[%c0_1, %c0_2] : memref<17x256xbf16, #tpu.memory_space<vmem>>, vector<17x256xbf16>
    %cst = arith.constant dense<0.000000e+00> : vector<8x256xf32>
    %2 = tpu.matmul %0, %1, %cst {dimension_numbers = #tpu.dot_dimension_numbers<[1], [0], [0], [1], [0, 0, 1, 1], [], []>} : vector<8x17xf32>, vector<17x256xbf16>, vector<8x256xf32> -> vector<8x256xf32>
    %c0_3 = arith.constant 0 : index
    %c0_4 = arith.constant 0 : index
    %3 = vector.load %arg3[%c0_3, %c0_4] : memref<1x256xf32, #tpu.memory_space<vmem>>, vector<1x256xf32>
    %4 = vector.broadcast %3 : vector<1x256xf32> to vector<8x256xf32>
    %5 = arith.addf %2, %4 : vector<8x256xf32>
    %cst_5 = arith.constant 0.000000e+00 : f32
    %6 = vector.broadcast %cst_5 : f32 to vector<8x256xf32>
    %7 = arith.maximumf %5, %6 : vector<8x256xf32>
    %c0_6 = arith.constant 0 : index
    %c0_7 = arith.constant 0 : index
    %8 = vector.load %arg4[%c0_6, %c0_7] : memref<256x256xbf16, #tpu.memory_space<vmem>>, vector<256x256xbf16>
    %cst_8 = arith.constant dense<0.000000e+00> : vector<8x256xf32>
    %9 = tpu.matmul %7, %8, %cst_8 {dimension_numbers = #tpu.dot_dimension_numbers<[1], [0], [0], [1], [0, 0, 1, 1], [], []>} : vector<8x256xf32>, vector<256x256xbf16>, vector<8x256xf32> -> vector<8x256xf32>
    %c0_9 = arith.constant 0 : index
    %c0_10 = arith.constant 0 : index
    %10 = vector.load %arg5[%c0_9, %c0_10] : memref<1x256xf32, #tpu.memory_space<vmem>>, vector<1x256xf32>
    %11 = vector.broadcast %10 : vector<1x256xf32> to vector<8x256xf32>
    %12 = arith.addf %9, %11 : vector<8x256xf32>
    %cst_11 = arith.constant 0.000000e+00 : f32
    %13 = vector.broadcast %cst_11 : f32 to vector<8x256xf32>
    %14 = arith.maximumf %12, %13 : vector<8x256xf32>
    %c0_12 = arith.constant 0 : index
    %c0_13 = arith.constant 0 : index
    %15 = vector.load %arg6[%c0_12, %c0_13] : memref<256x256xbf16, #tpu.memory_space<vmem>>, vector<256x256xbf16>
    %cst_14 = arith.constant dense<0.000000e+00> : vector<8x256xf32>
    %16 = tpu.matmul %14, %15, %cst_14 {dimension_numbers = #tpu.dot_dimension_numbers<[1], [0], [0], [1], [0, 0, 1, 1], [], []>} : vector<8x256xf32>, vector<256x256xbf16>, vector<8x256xf32> -> vector<8x256xf32>
    %c0_15 = arith.constant 0 : index
    %c0_16 = arith.constant 0 : index
    %17 = vector.load %arg7[%c0_15, %c0_16] : memref<1x256xf32, #tpu.memory_space<vmem>>, vector<1x256xf32>
    %18 = vector.broadcast %17 : vector<1x256xf32> to vector<8x256xf32>
    %19 = arith.addf %16, %18 : vector<8x256xf32>
    %cst_17 = arith.constant 0.000000e+00 : f32
    %20 = vector.broadcast %cst_17 : f32 to vector<8x256xf32>
    %21 = arith.maximumf %19, %20 : vector<8x256xf32>
    %c0_18 = arith.constant 0 : index
    %c0_19 = arith.constant 0 : index
    %22 = vector.load %arg8[%c0_18, %c0_19] : memref<1x256xbf16, #tpu.memory_space<vmem>>, vector<1x256xbf16>
    %23 = arith.extf %22 : vector<1x256xbf16> to vector<1x256xf32>
    %24 = vector.broadcast %23 : vector<1x256xf32> to vector<8x256xf32>
    %25 = arith.mulf %21, %24 : vector<8x256xf32>
    %cst_20 = arith.constant dense<0.000000e+00> : vector<8xf32>
    %26 = vector.multi_reduction <add>, %25, %cst_20 [1] : vector<8x256xf32> to vector<8xf32>
    %27 = vector.shape_cast %26 : vector<8xf32> to vector<8x1xf32>
    %c0_21 = arith.constant 0 : index
    %c0_22 = arith.constant 0 : index
    %28 = vector.load %arg9[%c0_21, %c0_22] : memref<1x1xf32, #tpu.memory_space<vmem>>, vector<1x1xf32>
    %29 = vector.broadcast %28 : vector<1x1xf32> to vector<8x1xf32>
    %30 = arith.addf %27, %29 : vector<8x1xf32>
    %c0_23 = arith.constant 0 : index
    %c0_24 = arith.constant 0 : index
    %31 = vector.load %arg10[%c0_23, %c0_24] : memref<8x1xf32, #tpu.memory_space<vmem>>, vector<8x1xf32>
    tpu.vector_store %arg10[%c0_23, %c0_24], %30 {strides = array<i32>} : memref<8x1xf32, #tpu.memory_space<vmem>>, vector<8x1xf32>,
    return
  }
  func.func @transform_0(%arg0: i32) -> (i32, i32) {
    %c0_i32 = arith.constant 0 : i32
    %c0_i32_0 = arith.constant 0 : i32
    return %arg0, %c0_i32 : i32, i32
  }
  func.func @transform_1(%arg0: i32) -> (i32, i32) {
    %c0_i32 = arith.constant 0 : i32
    %c0_i32_0 = arith.constant 0 : i32
    %c0_i32_1 = arith.constant 0 : i32
    return %c0_i32, %c0_i32_0 : i32, i32
  }
  func.func @transform_2(%arg0: i32) -> (i32, i32) {
    %c0_i32 = arith.constant 0 : i32
    %c0_i32_0 = arith.constant 0 : i32
    %c0_i32_1 = arith.constant 0 : i32
    return %c0_i32, %c0_i32_0 : i32, i32
  }
  func.func @transform_3(%arg0: i32) -> (i32, i32) {
    %c0_i32 = arith.constant 0 : i32
    %c0_i32_0 = arith.constant 0 : i32
    %c0_i32_1 = arith.constant 0 : i32
    return %c0_i32, %c0_i32_0 : i32, i32
  }
  func.func @transform_4(%arg0: i32) -> (i32, i32) {
    %c0_i32 = arith.constant 0 : i32
    %c0_i32_0 = arith.constant 0 : i32
    %c0_i32_1 = arith.constant 0 : i32
    return %c0_i32, %c0_i32_0 : i32, i32
  }
  func.func @transform_5(%arg0: i32) -> (i32, i32) {
    %c0_i32 = arith.constant 0 : i32
    %c0_i32_0 = arith.constant 0 : i32
    %c0_i32_1 = arith.constant 0 : i32
    return %c0_i32, %c0_i32_0 : i32, i32
  }
  func.func @transform_6(%arg0: i32) -> (i32, i32) {
    %c0_i32 = arith.constant 0 : i32
    %c0_i32_0 = arith.constant 0 : i32
    %c0_i32_1 = arith.constant 0 : i32
    return %c0_i32, %c0_i32_0 : i32, i32
  }
  func.func @transform_7(%arg0: i32) -> (i32, i32) {
    %c0_i32 = arith.constant 0 : i32
    %c0_i32_0 = arith.constant 0 : i32
    %c0_i32_1 = arith.constant 0 : i32
    return %c0_i32, %c0_i32_0 : i32, i32
  }
  func.func @transform_8(%arg0: i32) -> (i32, i32) {
    %c0_i32 = arith.constant 0 : i32
    %c0_i32_0 = arith.constant 0 : i32
    %c0_i32_1 = arith.constant 0 : i32
    return %c0_i32, %c0_i32_0 : i32, i32
  }
  func.func @transform_9(%arg0: i32) -> (i32, i32) {
    %c0_i32 = arith.constant 0 : i32
    %c0_i32_0 = arith.constant 0 : i32
    return %arg0, %c0_i32 : i32, i32
  }
}

</mosaic_0001>

<bundles_post_ra>
// kernel: tpu_custom_call.1
= control target key start
LH: loop header
LB: loop body
LE: loop exit
PB: predicated region body
PF: predicated region fallthrough
CT: control target
= control target key end

     0   :  { %s1213_s0 = inlined_call_operand.hbm [shape: f32[8,17], index: 0, kind: input, shape index: {}]   ;;  %s1214_s1 = inlined_call_operand.hbm [shape: bf16[17,256], index: 1, kind: input, shape index: {}]   ;;  %s1215_s2 = inlined_call_operand.vmem [shape: f32[1,256], index: 2, kind: input, shape index: {}]   ;;  %s1216_s3 = inlined_call_operand.hbm [shape: bf16[256,256], index: 3, kind: input, shape index: {}]   ;;  %s1217_s4 = inlined_call_operand.vmem [shape: f32[1,256], index: 4, kind: input, shape index: {}]   ;;  %s1218_s5 = inlined_call_operand.hbm [shape: bf16[256,256], index: 5, kind: input, shape index: {}]   ;;  %s1219_s6 = inlined_call_operand.vmem [shape: f32[1,256], index: 6, kind: input, shape index: {}]   ;;  %s1220_s7 = inlined_call_operand.vmem [shape: bf16[1,256], index: 7, kind: input, shape index: {}]   ;;  %s1221_s8 = inlined_call_operand.<no memory space> [shape: f32[1,1], index: 8, kind: input, shape index: {}]   ;;  %s1222_s9 = inlined_call_operand.vmem [shape: f32[8,1], index: 9, kind: output, shape index: {}]  }
   0x1   :  { %v14_v0 = vstv %s1221_s8 }
   0x2   :  { %15 = vst [vmem:[#allocation2] sm:$0x1] %v14_v0 }
   0x3   :  { %16 = vsyncpa [#allocation4], 0 }
   0x4   :  { %17 = vsyncpa [#allocation6], 0  ;;  %s34_s13 = sshll.u32 %s1214_s1, 4  ;;  %s35_s13 = int_to_ptr.hbm [resolvable:$true] %s34_s13 }
   0x5   :  { %18 = vsyncpa [#allocation9], 0  ;;  %s1126_s14 = smov [#allocation5]   ;;  %s24_s18 = sshll.u32 %s1213_s0, 4  ;;  %s25_s18 = int_to_ptr.hbm [resolvable:$true] %s24_s18 }
   0x6   :  { %s36_s15 = sshll.u32 %s1126_s14, 4  ;;  %s1127_s19 = smov 128   ;;  %s37_s15 = int_to_ptr.vmem [resolvable:$true] %s36_s15 }
   0x7   :  { %s1128_s20 = smov 8   ;;  %s1129_s8 = smov [#allocation3]  }
   0x8   :  { %42 = dma.hbm_to_vmem [thread:$0]  %s35_s13, 384, %s37_s15, [#allocation6], %s1127_s19, %s1127_s19, %s1128_s20  }
   0x9   :  { %s26_s21 = sshll.u32 %s1129_s8, 4  ;;  %s49_s24 = sshll.u32 %s1216_s3, 4  ;;  %s27_s21 = int_to_ptr.vmem [resolvable:$true] %s26_s21  ;;  %s50_s24 = int_to_ptr.hbm [resolvable:$true] %s49_s24 }
   0xa   :  { %29 = dma.hbm_to_vmem [thread:$0]  %s25_s18, 128, %s27_s21, [#allocation4]  }
   0xb   :  { %s64_s26 = sshll.u32 %s1218_s5, 4  ;;  %s1130_s27 = smov [#allocation7]   ;;  %s65_s26 = int_to_ptr.hbm [resolvable:$true] %s64_s26 }
   0xc   :  { %s51_s28 = sshll.u32 %s1130_s27, 4  ;;  %s1131_s0 = smov [#allocation8]   ;;  %s52_s28 = int_to_ptr.vmem [resolvable:$true] %s51_s28 }
   0xd   :  { %57 = dma.hbm_to_vmem [thread:$0]  %s50_s24, 4096, %s52_s28, [#allocation6], %s1127_s19, %s1127_s19, %s1128_s20  }
   0xe   :  { %s66_s29 = sshll.u32 %s1131_s0, 4  ;;  %s67_s29 = int_to_ptr.vmem [resolvable:$true] %s66_s29 }
   0xf   :  { %72 = dma.hbm_to_vmem [thread:$0]  %s65_s26, 4096, %s67_s29, [#allocation9], %s1127_s19, %s1127_s19, %s1128_s20  }
  0x10   :  { %1120 = dma.done.wait [#allocation4], 128  }
  0x11   :  { %1121 = vsyncadd [#allocation4], 4294967168 }
  0x12   :  { %1122 = dma.done.wait [#allocation6], 4480  }
  0x13   :  { %1123 = vsyncadd [#allocation6], 4294962816 }
  0x14   :  { %1124 = dma.done.wait [#allocation9], 4096  }
  0x15   :  { %1125 = vsyncadd [#allocation9], 4294963200  ;;  %vm125_vm0 = vcmask 1040384   ;;  %v99_v1 = vld [vmem:[#allocation5 + $0x10] sm:$0x11]  ;;  %v1132_v3 = vmov 0  }
  0x16   :  { %v113_v2 = vunpack.c.l.b16 %v99_v1  ;;  %v127_v4 = vsel %vm125_vm0, 65535, %v1132_v3  ;;  %v114_v5 = vunpack.c.h.b16 %v99_v1  ;;  %v686_v6 = vld [vmem:[#allocation5] sm:$0xf]  ;;  %v951_v7 = vld [vmem:[#allocation5 + $0x4] sm:$0xf0]  ;;  %v96_v45 = vld [vmem:[#allocation3] sm:$0xff] }
  0x17   :  { %v950_v8 = vld [vmem:[#allocation5 + $0x4] sm:$0xf]  ;;  %v752_v9 = vld [vmem:[#allocation7 + $0x70] sm:$0xf]  ;;  %v967_v10 = vld [vmem:[#allocation7 + $0x74] sm:$0xf0]  ;;  %v687_v29 = vor.u32 %v951_v7, %v686_v6 }
  0x18   :  { %v117_v11 = vpack.c.b16 %v113_v2, %v113_v2  ;;  %v118_v12 = vpack.c.b16 %v114_v5, %v114_v5  ;;  %v688_v13 = vld [vmem:[#allocation5 + $0x8] sm:$0xf0]  ;;  %v753_v14 = vor.u32 %v967_v10, %v752_v9  ;;  %v816_v15 = vld [vmem:[#allocation7 + $0xf0] sm:$0xf]  ;;  %v983_v16 = vld [vmem:[#allocation7 + $0xf4] sm:$0xf0] }
  0x19   :  { %v966_v17 = vld [vmem:[#allocation7 + $0x74] sm:$0xf]  ;;  %v754_v18 = vld [vmem:[#allocation7 + $0x78] sm:$0xf0]  ;;  %v817_v19 = vor.u32 %v983_v16, %v816_v15  ;;  %v744_v20 = vld [vmem:[#allocation7 + $0x60] sm:$0xf]  ;;  %v691_v30 = vor.u32 %v950_v8, %v688_v13 }
  0x1a   :  { %v129_v21 = vand.u32 %v127_v4, %v117_v11  ;;  %v132_v22 = vand.u32 %v127_v4, %v118_v12  ;;  %358 = vmatpush.bf16.msra.mxu2 %v753_v14  ;;  %v982_v23 = vld [vmem:[#allocation7 + $0xf4] sm:$0xf]  ;;  %v818_v24 = vld [vmem:[#allocation7 + $0xf8] sm:$0xf0]  ;;  %v965_v25 = vld [vmem:[#allocation7 + $0x64] sm:$0xf0]  ;;  %v757_v34 = vor.u32 %v966_v17, %v754_v18 }
  0x1b   :  { %370 = vmatpush.bf16.msra.mxu3 %v817_v19  ;;  %v745_v26 = vor.u32 %v965_v25, %v744_v20  ;;  %v808_v27 = vld [vmem:[#allocation7 + $0xe0] sm:$0xf]  ;;  %v981_v28 = vld [vmem:[#allocation7 + $0xe4] sm:$0xf0]  ;;  %v736_v32 = vld [vmem:[#allocation7 + $0x50] sm:$0xf]  ;;  %v821_v35 = vor.u32 %v982_v23, %v818_v24 }
  0x1c   :  { %140 = vmatpush.bf16.msra.mxu0 %v129_v21  ;;  %152 = vmatpush.bf16.msra.mxu1 %v132_v22  ;;  %v809_v31 = vor.u32 %v981_v28, %v808_v27  ;;  %v963_v33 = vld [vmem:[#allocation7 + $0x54] sm:$0xf0]  ;;  %v964_v36 = vld [vmem:[#allocation7 + $0x64] sm:$0xf]  ;;  %v746_v37 = vld [vmem:[#allocation7 + $0x68] sm:$0xf0] }
  0x1d   :  { %v800_v38 = vld [vmem:[#allocation7 + $0xd0] sm:$0xf]  ;;  %v980_v39 = vld [vmem:[#allocation7 + $0xe4] sm:$0xf]  ;;  %v810_v40 = vld [vmem:[#allocation7 + $0xe8] sm:$0xf0]  ;;  %v737_v41 = vor.u32 %v963_v33, %v736_v32  ;;  %v749_v47 = vor.u32 %v964_v36, %v746_v37 }
  0x1e   :  { %359 = vmatpush.bf16.msra.mxu2 %v745_v26  ;;  %v979_v42 = vld [vmem:[#allocation7 + $0xd4] sm:$0xf0]  ;;  %v728_v43 = vld [vmem:[#allocation7 + $0x40] sm:$0xf]  ;;  %v961_v44 = vld [vmem:[#allocation7 + $0x44] sm:$0xf0]  ;;  %v813_v48 = vor.u32 %v980_v39, %v810_v40 }
  0x1f   :  { %371 = vmatpush.bf16.msra.mxu3 %v809_v31  ;;  %vm121_vm1 = vcmask 138240   ;;  %v801_v46 = vor.u32 %v979_v42, %v800_v38  ;;  %v962_v49 = vld [vmem:[#allocation7 + $0x54] sm:$0xf]  ;;  %v792_v50 = vld [vmem:[#allocation7 + $0xc0] sm:$0xf]  ;;  %v729_v55 = vor.u32 %v961_v44, %v728_v43  ;;  %vm675_vm2 = vcmask 7168  }
  0x20   :  { %141 = vmatpush.bf16.msra.mxu0 %v687_v29  ;;  %153 = vmatpush.bf16.msra.mxu1 %v691_v30  ;;  %v977_v51 = vld [vmem:[#allocation7 + $0xc4] sm:$0xf0]  ;;  %v738_v52 = vld [vmem:[#allocation7 + $0x58] sm:$0xf0]  ;;  %v978_v53 = vld [vmem:[#allocation7 + $0xd4] sm:$0xf] }
  0x21   :  { %v802_v54 = vld [vmem:[#allocation7 + $0xd8] sm:$0xf0]  ;;  %v720_v56 = vld [vmem:[#allocation7 + $0x30] sm:$0xf]  ;;  %v959_v57 = vld [vmem:[#allocation7 + $0x34] sm:$0xf0]  ;;  %v793_v58 = vor.u32 %v977_v51, %v792_v50  ;;  %v741_v59 = vor.u32 %v962_v49, %v738_v52 }
  0x22   :  { %360 = vmatpush.bf16.msra.mxu2 %v737_v41  ;;  %v805_v60 = vor.u32 %v978_v53, %v802_v54  ;;  %v960_v61 = vld [vmem:[#allocation7 + $0x44] sm:$0xf]  ;;  %v784_v62 = vld [vmem:[#allocation7 + $0xb0] sm:$0xf]  ;;  %v975_v63 = vld [vmem:[#allocation7 + $0xb4] sm:$0xf0]  ;;  %v721_v3 = vor.u32 %v959_v57, %v720_v56 }
  0x23   :  { %692 = vmatmul.msk.f32.vlgmr.msra.gmra.mxu0 %vm121_vm1, %v96_v45  ;;  %693 = vmatmul.msk.f32.vlgmr.msra.gmra.mxu1 %vm121_vm1, %v96_v45  ;;  %v730_v0 = vld [vmem:[#allocation7 + $0x48] sm:$0xf0]  ;;  %v976_v1 = vld [vmem:[#allocation7 + $0xc4] sm:$0xf]  ;;  %v712_v4 = vld [vmem:[#allocation7 + $0x20] sm:$0xf]  ;;  %v785_v6 = vor.u32 %v975_v63, %v784_v62 }
  0x24   :  { %382 = vmatpush.bf16.msrb.mxu0 %v757_v34  ;;  %394 = vmatpush.bf16.msrb.mxu1 %v821_v35  ;;  %v794_v2 = vld [vmem:[#allocation7 + $0xc8] sm:$0xf0]  ;;  %v957_v5 = vld [vmem:[#allocation7 + $0x24] sm:$0xf0]  ;;  %v733_v7 = vor.u32 %v960_v61, %v730_v0  ;;  %v958_v9 = vld [vmem:[#allocation7 + $0x34] sm:$0xf] }
  0x25   :  { %372 = vmatpush.bf16.msra.mxu3 %v801_v46  ;;  %v797_v8 = vor.u32 %v976_v1, %v794_v2  ;;  %v776_v10 = vld [vmem:[#allocation7 + $0xa0] sm:$0xf]  ;;  %v973_v11 = vld [vmem:[#allocation7 + $0xa4] sm:$0xf0]  ;;  %v722_v12 = vld [vmem:[#allocation7 + $0x38] sm:$0xf0]  ;;  %v713_v15 = vor.u32 %v957_v5, %v712_v4 }
  0x26   :  { %361 = vmatpush.bf16.msra.mxu2 %v729_v55  ;;  %v974_v13 = vld [vmem:[#allocation7 + $0xb4] sm:$0xf]  ;;  %v786_v14 = vld [vmem:[#allocation7 + $0xb8] sm:$0xf0]  ;;  %v704_v16 = vld [vmem:[#allocation7 + $0x10] sm:$0xf]  ;;  %v777_v18 = vor.u32 %v973_v11, %v776_v10  ;;  %v725_v19 = vor.u32 %v958_v9, %v722_v12 }
  0x27   :  { %v955_v17 = vld [vmem:[#allocation7 + $0x14] sm:$0xf0]  ;;  %v789_v20 = vor.u32 %v974_v13, %v786_v14  ;;  %v956_v21 = vld [vmem:[#allocation7 + $0x24] sm:$0xf]  ;;  %v714_v22 = vld [vmem:[#allocation7 + $0x28] sm:$0xf0] }
  0x28   :  { %383 = vmatpush.bf16.msrb.mxu0 %v749_v47  ;;  %395 = vmatpush.bf16.msrb.mxu1 %v813_v48  ;;  %v972_v23 = vld [vmem:[#allocation7 + $0xa4] sm:$0xf]  ;;  %v778_v24 = vld [vmem:[#allocation7 + $0xa8] sm:$0xf0]  ;;  %v705_v25 = vor.u32 %v955_v17, %v704_v16  ;;  %v717_v26 = vor.u32 %v956_v21, %v714_v22  ;;  %v954_v28 = vld [vmem:[#allocation7 + $0x14] sm:$0xf] }
  0x29   :  { %373 = vmatpush.bf16.msra.mxu3 %v793_v58  ;;  %v781_v27 = vor.u32 %v972_v23, %v778_v24  ;;  %v706_v29 = vld [vmem:[#allocation7 + $0x18] sm:$0xf0]  ;;  %v768_v31 = vld [vmem:[#allocation7 + $0x90] sm:$0xf]  ;;  %v971_v32 = vld [vmem:[#allocation7 + $0x94] sm:$0xf0] }
  0x2a   :  { %362 = vmatpush.bf16.msra.mxu2 %v721_v3  ;;  %v709_v30 = vor.u32 %v954_v28, %v706_v29  ;;  %v970_v33 = vld [vmem:[#allocation7 + $0x94] sm:$0xf]  ;;  %v769_v34 = vor.u32 %v971_v32, %v768_v31  ;;  %v770_v35 = vld [vmem:[#allocation7 + $0x98] sm:$0xf0]  ;;  %v696_v37 = vld [vmem:[#allocation7] sm:$0xf] }
  0x2b   :  { %v773_v36 = vor.u32 %v970_v33, %v770_v35  ;;  %v953_v38 = vld [vmem:[#allocation7 + $0x4] sm:$0xf0]  ;;  %v952_v39 = vld [vmem:[#allocation7 + $0x4] sm:$0xf]  ;;  %v698_v41 = vld [vmem:[#allocation7 + $0x8] sm:$0xf0] }
  0x2c   :  { %384 = vmatpush.bf16.msrb.mxu0 %v741_v59  ;;  %396 = vmatpush.bf16.msrb.mxu1 %v805_v60  ;;  %v697_v40 = vor.u32 %v953_v38, %v696_v37  ;;  %v701_v42 = vor.u32 %v952_v39, %v698_v41  ;;  %v760_v43 = vld [vmem:[#allocation7 + $0x80] sm:$0xf]  ;;  %v969_v44 = vld [vmem:[#allocation7 + $0x84] sm:$0xf0]  ;;  %v968_v46 = vld [vmem:[#allocation7 + $0x84] sm:$0xf] }
  0x2d   :  { %374 = vmatpush.bf16.msra.mxu3 %v785_v6  ;;  %v761_v45 = vor.u32 %v969_v44, %v760_v43  ;;  %v762_v47 = vld [vmem:[#allocation7 + $0x88] sm:$0xf0]  ;;  %v944_v49 = vld [vmem:[#allocation8 + $0xf0] sm:$0xf]  ;;  %v1015_v50 = vld [vmem:[#allocation8 + $0xf4] sm:$0xf0] }
  0x2e   :  { %363 = vmatpush.bf16.msra.mxu2 %v713_v15  ;;  %v765_v48 = vor.u32 %v968_v46, %v762_v47  ;;  %v1014_v51 = vld [vmem:[#allocation8 + $0xf4] sm:$0xf]  ;;  %v945_v52 = vor.u32 %v1015_v50, %v944_v49  ;;  %v946_v53 = vld [vmem:[#allocation8 + $0xf8] sm:$0xf0]  ;;  %v936_v54 = vld [vmem:[#allocation8 + $0xe0] sm:$0xf] }
  0x2f   :  { %v1013_v55 = vld [vmem:[#allocation8 + $0xe4] sm:$0xf0]  ;;  %v949_v56 = vor.u32 %v1014_v51, %v946_v53  ;;  %v1012_v57 = vld [vmem:[#allocation8 + $0xe4] sm:$0xf]  ;;  %v938_v58 = vld [vmem:[#allocation8 + $0xe8] sm:$0xf0] }
  0x30   :  { %385 = vmatpush.bf16.msrb.mxu0 %v733_v7  ;;  %397 = vmatpush.bf16.msrb.mxu1 %v797_v8  ;;  %v880_v59 = vld [vmem:[#allocation8 + $0x70] sm:$0xf]  ;;  %v937_v60 = vor.u32 %v1013_v55, %v936_v54  ;;  %v999_v61 = vld [vmem:[#allocation8 + $0x74] sm:$0xf0]  ;;  %v998_v62 = vld [vmem:[#allocation8 + $0x74] sm:$0xf]  ;;  %v941_v0 = vor.u32 %v1012_v57, %v938_v58 }
  0x31   :  { %375 = vmatpush.bf16.msra.mxu3 %v777_v18  ;;  %v882_v63 = vld [vmem:[#allocation8 + $0x78] sm:$0xf0]  ;;  %v881_v1 = vor.u32 %v999_v61, %v880_v59  ;;  %v928_v3 = vld [vmem:[#allocation8 + $0xd0] sm:$0xf]  ;;  %v1011_v4 = vld [vmem:[#allocation8 + $0xd4] sm:$0xf0] }
  0x32   :  { %364 = vmatpush.bf16.msra.mxu2 %v705_v25  ;;  %v885_v2 = vor.u32 %v998_v62, %v882_v63  ;;  %v1010_v5 = vld [vmem:[#allocation8 + $0xd4] sm:$0xf]  ;;  %v930_v6 = vld [vmem:[#allocation8 + $0xd8] sm:$0xf0]  ;;  %v872_v7 = vld [vmem:[#allocation8 + $0x60] sm:$0xf]  ;;  %v929_v12 = vor.u32 %v1011_v4, %v928_v3 }
  0x33   :  { %v997_v8 = vld [vmem:[#allocation8 + $0x64] sm:$0xf0]  ;;  %v996_v10 = vld [vmem:[#allocation8 + $0x64] sm:$0xf]  ;;  %v874_v11 = vld [vmem:[#allocation8 + $0x68] sm:$0xf0]  ;;  %v933_v16 = vor.u32 %v1010_v5, %v930_v6 }
  0x34   :  { %386 = vmatpush.bf16.msrb.mxu0 %v725_v19  ;;  %398 = vmatpush.bf16.msrb.mxu1 %v789_v20  ;;  %v873_v9 = vor.u32 %v997_v8, %v872_v7  ;;  %v877_v13 = vor.u32 %v996_v10, %v874_v11  ;;  %v920_v14 = vld [vmem:[#allocation8 + $0xc0] sm:$0xf]  ;;  %v1009_v15 = vld [vmem:[#allocation8 + $0xc4] sm:$0xf0]  ;;  %v864_v17 = vld [vmem:[#allocation8 + $0x50] sm:$0xf] }
  0x35   :  { %376 = vmatpush.bf16.msra.mxu3 %v769_v34  ;;  %v995_v18 = vld [vmem:[#allocation8 + $0x54] sm:$0xf0]  ;;  %v994_v19 = vld [vmem:[#allocation8 + $0x54] sm:$0xf]  ;;  %v1008_v20 = vld [vmem:[#allocation8 + $0xc4] sm:$0xf] }
  0x36   :  { %365 = vmatpush.bf16.msra.mxu2 %v697_v40  ;;  %v922_v21 = vld [vmem:[#allocation8 + $0xc8] sm:$0xf0]  ;;  %v866_v22 = vld [vmem:[#allocation8 + $0x58] sm:$0xf0]  ;;  %v865_v23 = vor.u32 %v995_v18, %v864_v17  ;;  %v856_v25 = vld [vmem:[#allocation8 + $0x40] sm:$0xf] }
  0x37   :  { %v869_v24 = vor.u32 %v994_v19, %v866_v22  ;;  %v992_v28 = vld [vmem:[#allocation8 + $0x44] sm:$0xf]  ;;  %v858_v29 = vld [vmem:[#allocation8 + $0x48] sm:$0xf0]  ;;  %v912_v31 = vld [vmem:[#allocation8 + $0xb0] sm:$0xf] }
  0x38   :  { %387 = vmatpush.bf16.msrb.mxu0 %v717_v26  ;;  %399 = vmatpush.bf16.msrb.mxu1 %v781_v27  ;;  %v921_v26 = vor.u32 %v1009_v15, %v920_v14  ;;  %v993_v27 = vld [vmem:[#allocation8 + $0x44] sm:$0xf0]  ;;  %v1007_v32 = vld [vmem:[#allocation8 + $0xb4] sm:$0xf0]  ;;  %v1006_v33 = vld [vmem:[#allocation8 + $0xb4] sm:$0xf] }
  0x39   :  { %377 = vmatpush.bf16.msra.mxu3 %v761_v45  ;;  %v914_v34 = vld [vmem:[#allocation8 + $0xb8] sm:$0xf0]  ;;  %v857_v35 = vor.u32 %v993_v27, %v856_v25  ;;  %v848_v37 = vld [vmem:[#allocation8 + $0x30] sm:$0xf]  ;;  %v913_v38 = vor.u32 %v1007_v32, %v912_v31  ;;  %v991_v39 = vld [vmem:[#allocation8 + $0x34] sm:$0xf0] }
  0x3a   :  { %606 = vmatpush.bf16.msrb.mxu2 %v881_v1  ;;  %v990_v40 = vld [vmem:[#allocation8 + $0x34] sm:$0xf]  ;;  %v850_v41 = vld [vmem:[#allocation8 + $0x38] sm:$0xf0]  ;;  %v904_v43 = vld [vmem:[#allocation8 + $0xa0] sm:$0xf]  ;;  %v849_v47 = vor.u32 %v991_v39, %v848_v37 }
  0x3b   :  { %v1005_v44 = vld [vmem:[#allocation8 + $0xa4] sm:$0xf0]  ;;  %v1004_v45 = vld [vmem:[#allocation8 + $0xa4] sm:$0xf]  ;;  %v906_v46 = vld [vmem:[#allocation8 + $0xa8] sm:$0xf0] }
  0x3c   :  { %388 = vmatpush.bf16.msrb.mxu0 %v709_v30  ;;  %400 = vmatpush.bf16.msrb.mxu1 %v773_v36  ;;  %v925_v30 = vor.u32 %v1008_v20, %v922_v21  ;;  %v861_v36 = vor.u32 %v992_v28, %v858_v29  ;;  %v905_v49 = vor.u32 %v1005_v44, %v904_v43  ;;  %v100_v50 = vld [vmem:[%s1215_s2] sm:$0x3]  ;;  %v1003_v61 = vld [vmem:[#allocation8 + $0x94] sm:$0xf0]  ;;  %v1002_v62 = vld [vmem:[#allocation8 + $0x94] sm:$0xf] }
  0x3d   :  { %618 = vmatpush.bf16.msrb.mxu3 %v945_v52  ;;  %v909_v51 = vor.u32 %v1004_v45, %v906_v46  ;;  %v102_v52 = vperm.slane %v100_v50, 0  ;;  %v103_v53 = vperm.slane %v100_v50, 1  ;;  %v989_v3 = vld [vmem:[#allocation8 + $0x24] sm:$0xf0]  ;;  %v988_v4 = vld [vmem:[#allocation8 + $0x24] sm:$0xf] }
  0x3e   :  { %607 = vmatpush.bf16.msrb.mxu2 %v873_v9  ;;  %v842_v6 = vld [vmem:[#allocation8 + $0x28] sm:$0xf0]  ;;  %v888_v8 = vld [vmem:[#allocation8 + $0x80] sm:$0xf]  ;;  %v1001_v9 = vld [vmem:[#allocation8 + $0x84] sm:$0xf0] }
  0x3f   :  { %v845_v7 = vor.u32 %v988_v4, %v842_v6  ;;  %v1000_v10 = vld [vmem:[#allocation8 + $0x84] sm:$0xf]  ;;  %v889_v11 = vor.u32 %v1001_v9, %v888_v8  ;;  %v832_v14 = vld [vmem:[#allocation8 + $0x10] sm:$0xf]  ;;  %v987_v15 = vld [vmem:[#allocation8 + $0x14] sm:$0xf0] }
  0x40   :  { %389 = vmatpush.bf16.msrb.mxu0 %v701_v42  ;;  %401 = vmatpush.bf16.msrb.mxu1 %v765_v48  ;;  %v917_v42 = vor.u32 %v1006_v33, %v914_v34  ;;  %v853_v48 = vor.u32 %v990_v40, %v850_v41  ;;  %v833_v17 = vor.u32 %v987_v15, %v832_v14  ;;  %v834_v18 = vld [vmem:[#allocation8 + $0x18] sm:$0xf0]  ;;  %v824_v20 = vld [vmem:[#allocation8] sm:$0xf]  ;;  %v985_v21 = vld [vmem:[#allocation8 + $0x4] sm:$0xf0] }
  0x41   :  { %619 = vmatpush.bf16.msrb.mxu3 %v937_v60  ;;  %v896_v60 = vld [vmem:[#allocation8 + $0x90] sm:$0xf]  ;;  %v984_v22 = vld [vmem:[#allocation8 + $0x4] sm:$0xf]  ;;  %v440_v39 = vld [vmem:[%s1219_s6] sm:$0x3] }
  0x42   :  { %608 = vmatpush.bf16.msrb.mxu2 %v865_v23  ;;  %v897_v63 = vor.u32 %v1003_v61, %v896_v60  ;;  %v825_v23 = vor.u32 %v985_v21, %v824_v20  ;;  %v443_v40 = vperm.slane %v440_v39, 1  ;;  %v656_v41 = vld [vmem:[%s1220_s7] sm:$0x3]  ;;  %v442_v45 = vperm.slane %v440_v39, 0 }
  0x43   :  { %v657_v44 = vunpack.c.l.bf16 %v656_v41  ;;  %v1023_v61 = vld [vmem:[#allocation2] ss:$0 sm:$0xff] }
  0x44   :  { %642 = vmatpush.bf16.msra.mxu1 %v949_v56  ;;  %630 = vmatpush.bf16.msra.mxu0 %v885_v2  ;;  %v840_v2 = vld [vmem:[#allocation8 + $0x20] sm:$0xf] }
  0x45   :  { %620 = vmatpush.bf16.msrb.mxu3 %v929_v12  ;;  %v841_v5 = vor.u32 %v989_v3, %v840_v2  ;;  %v890_v12 = vld [vmem:[#allocation8 + $0x88] sm:$0xf0] }
  0x46   :  { %609 = vmatpush.bf16.msrb.mxu2 %v857_v35 }
  0x48   :  { %643 = vmatpush.bf16.msra.mxu1 %v941_v0  ;;  %631 = vmatpush.bf16.msra.mxu0 %v877_v13  ;;  %v898_v0 = vld [vmem:[#allocation8 + $0x98] sm:$0xf0]  ;;  %v893_v13 = vor.u32 %v1000_v10, %v890_v12 }
  0x49   :  { %621 = vmatpush.bf16.msrb.mxu3 %v921_v26  ;;  %v901_v1 = vor.u32 %v1002_v62, %v898_v0  ;;  %v192_v26 = vld [vmem:[%s1217_s4] sm:$0x3] }
  0x4a   :  { %610 = vmatpush.bf16.msrb.mxu2 %v849_v47  ;;  %v195_v27 = vperm.slane %v192_v26, 1  ;;  %v194_v32 = vperm.slane %v192_v26, 0 }
  0x4c   :  { %644 = vmatpush.bf16.msra.mxu1 %v933_v16  ;;  %632 = vmatpush.bf16.msra.mxu0 %v869_v24  ;;  %v986_v16 = vld [vmem:[#allocation8 + $0x14] sm:$0xf]  ;;  %v826_v24 = vld [vmem:[#allocation8 + $0x8] sm:$0xf0] }
  0x4d   :  { %622 = vmatpush.bf16.msrb.mxu3 %v913_v38  ;;  %v837_v19 = vor.u32 %v986_v16, %v834_v18  ;;  %v829_v25 = vor.u32 %v984_v22, %v826_v24 }
  0x4e   :  { %611 = vmatpush.bf16.msrb.mxu2 %v841_v5 }
  0x50   :  { %645 = vmatpush.bf16.msra.mxu1 %v925_v30  ;;  %633 = vmatpush.bf16.msra.mxu0 %v861_v36 }
  0x51   :  { %623 = vmatpush.bf16.msrb.mxu3 %v905_v49  ;;  %v660_v49 = vperm.slane %v657_v44, 2 }
  0x52   :  { %612 = vmatpush.bf16.msrb.mxu2 %v833_v17 }
  0x54   :  { %646 = vmatpush.bf16.msra.mxu1 %v917_v42  ;;  %634 = vmatpush.bf16.msra.mxu0 %v853_v48  ;;  %v659_v48 = vperm.slane %v657_v44, 0 }
  0x55   :  { %624 = vmatpush.bf16.msrb.mxu3 %v897_v63 }
  0x56   :  { %613 = vmatpush.bf16.msrb.mxu2 %v825_v23 }
  0x58   :  { %647 = vmatpush.bf16.msra.mxu1 %v909_v51  ;;  %635 = vmatpush.bf16.msra.mxu0 %v845_v7 }
  0x59   :  { %625 = vmatpush.bf16.msrb.mxu3 %v889_v11 }
  0x5c   :  { %648 = vmatpush.bf16.msra.mxu1 %v901_v1  ;;  %636 = vmatpush.bf16.msra.mxu0 %v837_v19 }
  0x60   :  { %649 = vmatpush.bf16.msra.mxu1 %v893_v13  ;;  %637 = vmatpush.bf16.msra.mxu0 %v829_v25 }
  0xa0   :  { %v143_v54 = vpop.f32.mrf.mxu0  ;;  %v155_v55 = vpop.f32.mrf.mxu1 }
  0xa1   :  { %v144_v56 = vadd.f32 %v143_v54, %v102_v52  ;;  %v156_v57 = vadd.f32 %v155_v55, %v103_v53  ;;  %v663_v55 = vperm.slane %v659_v48, 0 }
  0xa3   :  { %v158_v58 = vmax.f32 %v144_v56, 0.0  ;;  %v159_v59 = vmax.f32 %v156_v57, 0.0  ;;  %v664_v56 = vperm.slane %v660_v49, 0 }
  0xa5   :  { %366 = vmatmul.f32.vlgmr.msra.gmra.mxu2 %v158_v58  ;;  %390 = vmatmul.f32.vlgmr.msrb.gmra.mxu0 %v158_v58 }
  0xa6   :  { %378 = vmatmul.f32.vlgmr.msra.gmra.mxu3 %v159_v59  ;;  %402 = vmatmul.f32.vlgmr.msrb.gmra.mxu1 %v159_v59 }
 0x122   :  { %v391_v28 = vpop.f32.mrf.mxu0 }
 0x123   :  { %v392_v29 = vadd.f32 %v391_v28, %v195_v27  ;;  %v403_v30 = vpop.f32.mrf.mxu1 }
 0x125   :  { %v404_v31 = vadd.f32 %v403_v30, %v392_v29 }
 0x127   :  { %v407_v33 = vmax.f32 %v404_v31, 0.0 }
 0x128   :  { %v367_v34 = vpop.f32.mrf.mxu2 }
 0x129   :  { %v368_v35 = vadd.f32 %v367_v34, %v194_v32  ;;  %626 = vmatmul.f32.vlgmr.msrb.gmra.mxu3 %v407_v33  ;;  %650 = vmatmul.f32.vlgmr.msra.gmra.mxu1 %v407_v33  ;;  %v379_v36 = vpop.f32.mrf.mxu3 }
 0x12b   :  { %v380_v37 = vadd.f32 %v379_v36, %v368_v35 }
 0x12d   :  { %v406_v38 = vmax.f32 %v380_v37, 0.0 }
 0x12f   :  { %614 = vmatmul.f32.vlgmr.msrb.gmra.mxu2 %v406_v38  ;;  %638 = vmatmul.f32.vlgmr.msra.gmra.mxu0 %v406_v38 }
 0x1a6   :  { %v651_v46 = vpop.f32.mrf.mxu1 }
 0x1ac   :  { %v639_v42 = vpop.f32.mrf.mxu0  ;;  %v627_v52 = vpop.f32.mrf.mxu3 }
 0x1ad   :  { %v640_v43 = vadd.f32 %v639_v42, %v443_v40 }
 0x1af   :  { %v652_v47 = vadd.f32 %v651_v46, %v640_v43 }
 0x1b1   :  { %v655_v53 = vmax.f32 %v652_v47, 0.0 }
 0x1b2   :  { %v615_v50 = vpop.f32.mrf.mxu2 }
 0x1b3   :  { %v616_v51 = vadd.f32 %v615_v50, %v442_v45  ;;  %v666_v59 = vmul.f32 %v664_v56, %v655_v53 }
 0x1b5   :  { %v628_v54 = vadd.f32 %v627_v52, %v616_v51 }
 0x1b7   :  { %v654_v57 = vmax.f32 %v628_v54, 0.0 }
 0x1b9   :  { %v665_v58 = vmul.f32 %v663_v55, %v654_v57 }
 0x1bb   :  { %v667_v60 = vadd.f32 %v666_v59, %v665_v58 }
 0x1bd   :  { %668 = vadd.xlane.f32.xlu0 %v667_v60 }
 0x230   :  { %v669_v62 = vpop.xlane.xlu0 %668 }
 0x231   :  { %v674_v63 = vadd.f32 %v1023_v61, %v669_v62 }
 0x233   :  { %676 = vst.msk [vmem:[%s1222_s9] sm:$0xff] %vm675_vm2, %v674_v63 }
 0x234   :  { %681 = vsyncpa [#allocation4], 1 }
 0x235   :  { %682 = vsyncpa [#allocation6], 1 }
 0x236   :  { %683 = vsyncpa [#allocation9], 1 }

</bundles_post_ra>
